<compile_context>
chip_gen: v5e
topology: v5e:2x2
jax: 0.10.0
libtpu: 0.0.40
codegen_flags: <defaults>
</compile_context>

<pallas_src>
import jax
import jax.numpy as jnp
from jax.experimental import pallas as pl
from jax.experimental.pallas import tpu as pltpu


def _round_up(a, b):
    return (a + b - 1) // b * b


def _cutouts_kernel(facs_ref, x_ref, noise_ref, o_ref):
    # facs_ref : (Cp, 1)   per-cutout noise factors (VMEM column, constant block -> fetched once)
    # x_ref    : (K, TM)   window-major pooling slab tile
    # noise_ref: (Cp, TM)  per-cutout gaussian noise tile
    # o_ref    : (Cp, TM)  output tile (Cp cutout rows, lane-dense)
    x = x_ref[...]
    # Pooling reduction done ONCE per m-tile (shared by every cutout row), sublane reduce over K.
    pooled = (jnp.mean(x, axis=0, keepdims=True)
              + jnp.max(x, axis=0, keepdims=True)) * 0.5                       # (1, TM)
    # TODO(synk): kornia RandomAffine / RandomPerspective / ColorJitter / RandomErasing
    # augmentations have no clean Pallas equivalent; treated as identity here.
    # TODO(synk): noise is supplied precomputed (bit-exact, verifiable); in-kernel
    # pltpu.stateful_normal generation would halve HBM traffic if exact RNG is not required.
    o_ref[...] = pooled + facs_ref[...] * noise_ref[...]                        # (Cp, TM)


def make_cutouts_pooling(x, facs, noise, *, cut_size, cutn, max_lanes_per_tile=None):
    """x: (N, C, H, W) f32; facs: (cutn,1,1,1); noise: (cutn*N, C, S, S). Returns (cutn*N, C, S, S)."""
    N, C, H, W = x.shape
    S = cut_size
    assert H % S == 0 and W % S == 0, "adaptive pool == uniform pool only for divisible sizes"
    assert N == 1, "the PyTorch module's noise broadcast (facs of shape [cutn,1,1,1]) requires N==1"
    kh, kw = H // S, W // S
    K = kh * kw
    M = N * C * S * S

    # ---- layout glue (no compute): window-major slab, lane-dense flattened pixels --------------
    xw = (x.reshape(N, C, S, kh, S, kw)
            .transpose(3, 5, 0, 1, 2, 4)
            .reshape(K, M).astype(jnp.float32))
    noise2d = noise.reshape(cutn, M).astype(jnp.float32)
    facs2d = facs.reshape(cutn, 1).astype(jnp.float32)

    # ---- tile sizing: sublane-pad cutouts, lane-dense 128-multiple M tiles ---------------------
    Cp = _round_up(max(cutn, 8), 8)                       # sublane-dense output rows
    try:
        vmem_cap = int(pltpu.get_tpu_info().vmem_capacity_bytes)
    except Exception:
        vmem_cap = 64 << 20                               # conservative fallback (v7x per-core)
    vmem_budget = vmem_cap // 2                           # larger tiles on 128 MiB parts, capped on v7x
    bytes_per_col = 2 * (K + 2 * Cp) * 4                  # double-buffered f32: slab + noise + out
    tm_cap = max(128, (vmem_budget // bytes_per_col) // 128 * 128)
    if max_lanes_per_tile is not None:
        tm_cap = min(tm_cap, max(128, (max_lanes_per_tile // 128) * 128))
    TM = min(_round_up(M, 128), tm_cap)
    M_pad = _round_up(M, TM)
    num_m = M_pad // TM
    vmem_limit = int(min(vmem_cap, vmem_budget + (16 << 20)))

    xw_p = jnp.pad(xw, ((0, 0), (0, M_pad - M)))
    noise_p = jnp.pad(noise2d, ((0, Cp - cutn), (0, M_pad - M)))
    facs_p = jnp.pad(facs2d, ((0, Cp - cutn), (0, 0)))

    out = pl.pallas_call(
        _cutouts_kernel,
        out_shape=jax.ShapeDtypeStruct((Cp, M_pad), jnp.float32),
        grid=(num_m,),
        in_specs=[
            pl.BlockSpec((Cp, 1), lambda m: (0, 0)),      # facs column (constant -> DMA'd once)
            pl.BlockSpec((K, TM), lambda m: (0, m)),      # pooling slab tile
            pl.BlockSpec((Cp, TM), lambda m: (0, m)),     # noise tile
        ],
        out_specs=pl.BlockSpec((Cp, TM), lambda m: (0, m)),
        compiler_params=pltpu.CompilerParams(
            dimension_semantics=("parallel",),            # m-tiles independent -> megacore on v7x
            vmem_limit_bytes=vmem_limit),
    )(facs_p, xw_p, noise_p)

    # strip padding; (cutn, M) -> (cutn, N, C, S, S) -> (cutn*N, C, S, S) == torch.cat(..., dim=0)
    out = out[:cutn, :M]
    return out.reshape(cutn, N, C, S, S).reshape(cutn * N, C, S, S)


if __name__ == "__main__":
    key = jax.random.PRNGKey(0)
    kx, kf, kn = jax.random.split(key, 3)

    # Small shapes consistent with the module (single RGB image, as in the original script).
    N, C, H, W = 1, 3, 32, 32
    cut_size, cutn, noise_fac = 8, 4, 0.1

    x = jax.random.uniform(kx, (N, C, H, W), jnp.float32)
    facs = jax.random.uniform(kf, (cutn, 1, 1, 1), jnp.float32, 0.0, noise_fac)
    noise = jax.random.normal(kn, (cutn * N, C, cut_size, cut_size), jnp.float32)

    # Pure-JAX reference for the implemented (deterministic-given-noise) semantics.
    kh, kw = H // cut_size, W // cut_size
    xr = x.reshape(N, C, cut_size, kh, cut_size, kw)
    pooled = (xr.mean(axis=(3, 5)) + xr.max(axis=(3, 5))) * 0.5                 # (N, C, S, S)
    ref = jnp.tile(pooled, (cutn, 1, 1, 1)) + facs.reshape(cutn, 1, 1, 1) * noise

    # Single-tile path (default tile sizing -> one grid step at this size).
    out = make_cutouts_pooling(x, facs, noise, cut_size=cut_size, cutn=cutn)
    out = jax.block_until_ready(out)
    assert out.shape == (cutn * N, C, cut_size, cut_size)
    assert out.dtype == jnp.float32
    assert jnp.allclose(out, ref, atol=1e-5, rtol=1e-5)

    # Multi-tile path (force TM=128 so the lane dimension is tiled across >1 grid steps).
    out2 = make_cutouts_pooling(x, facs, noise, cut_size=cut_size, cutn=cutn,
                                max_lanes_per_tile=128)
    out2 = jax.block_until_ready(out2)
    assert jnp.allclose(out2, ref, atol=1e-5, rtol=1e-5)

    print("KERNEL_OK")
</pallas_src>

<mosaic_0001>
module attributes {stable_mosaic.version = 11 : i64} {
  func.func @_cutouts_kernel(%arg0: i32, %arg1: memref<8x1xf32, #tpu.memory_space<vmem>>, %arg2: memref<16x256xf32, #tpu.memory_space<vmem>>, %arg3: memref<8x256xf32, #tpu.memory_space<vmem>>, %arg4: memref<8x256xf32, #tpu.memory_space<vmem>>) attributes {dimension_semantics = [#tpu.dimension_semantics<parallel>], iteration_bounds = array<i64: 1>, scalar_prefetch = 0 : i64, scratch_operands = 0 : i64, tpu.core_type = #tpu.core_type<tc>, window_params = [{pipeline_mode = #tpu.pipeline_mode<synchronous>, transform_indices = @transform_0, window_bounds = array<i64: 8, 1>}, {transform_indices = @transform_1, window_bounds = array<i64: 16, 256>}, {transform_indices = @transform_2, window_bounds = array<i64: 8, 256>}, {transform_indices = @transform_3, window_bounds = array<i64: 8, 256>}]} {
    %c0 = arith.constant 0 : index
    %c0_0 = arith.constant 0 : index
    %0 = vector.load %arg2[%c0, %c0_0] : memref<16x256xf32, #tpu.memory_space<vmem>>, vector<16x256xf32>
    %cst = arith.constant dense<0.000000e+00> : vector<256xf32>
    %1 = vector.multi_reduction <add>, %0, %cst [0] : vector<16x256xf32> to vector<256xf32>
    %2 = vector.shape_cast %1 : vector<256xf32> to vector<1x256xf32>
    %cst_1 = arith.constant 1.600000e+01 : f32
    %3 = vector.broadcast %cst_1 : f32 to vector<1x256xf32>
    %4 = arith.divf %2, %3 : vector<1x256xf32>
    %cst_2 = arith.constant dense<0xFF800000> : vector<256xf32>
    %5 = vector.multi_reduction <maximumf>, %0, %cst_2 [0] : vector<16x256xf32> to vector<256xf32>
    %6 = vector.shape_cast %5 : vector<256xf32> to vector<1x256xf32>
    %7 = arith.addf %4, %6 : vector<1x256xf32>
    %cst_3 = arith.constant 5.000000e-01 : f32
    %8 = vector.broadcast %cst_3 : f32 to vector<1x256xf32>
    %9 = arith.mulf %7, %8 : vector<1x256xf32>
    %c0_4 = arith.constant 0 : index
    %c0_5 = arith.constant 0 : index
    %10 = vector.load %arg1[%c0_4, %c0_5] : memref<8x1xf32, #tpu.memory_space<vmem>>, vector<8x1xf32>
    %c0_6 = arith.constant 0 : index
    %c0_7 = arith.constant 0 : index
    %11 = vector.load %arg3[%c0_6, %c0_7] : memref<8x256xf32, #tpu.memory_space<vmem>>, vector<8x256xf32>
    %12 = vector.broadcast %10 : vector<8x1xf32> to vector<8x256xf32>
    %13 = arith.mulf %12, %11 : vector<8x256xf32>
    %14 = vector.broadcast %9 : vector<1x256xf32> to vector<8x256xf32>
    %15 = arith.addf %14, %13 : vector<8x256xf32>
    %c0_8 = arith.constant 0 : index
    %c0_9 = arith.constant 0 : index
    %16 = vector.load %arg4[%c0_8, %c0_9] : memref<8x256xf32, #tpu.memory_space<vmem>>, vector<8x256xf32>
    tpu.vector_store %arg4[%c0_8, %c0_9], %15 {strides = array<i32>} : memref<8x256xf32, #tpu.memory_space<vmem>>, vector<8x256xf32>,
    return
  }
  func.func @transform_0(%arg0: i32) -> (i32, i32) {
    %c0_i32 = arith.constant 0 : i32
    %c0_i32_0 = arith.constant 0 : i32
    %c0_i32_1 = arith.constant 0 : i32
    return %c0_i32, %c0_i32_0 : i32, i32
  }
  func.func @transform_1(%arg0: i32) -> (i32, i32) {
    %c0_i32 = arith.constant 0 : i32
    %c0_i32_0 = arith.constant 0 : i32
    return %c0_i32, %arg0 : i32, i32
  }
  func.func @transform_2(%arg0: i32) -> (i32, i32) {
    %c0_i32 = arith.constant 0 : i32
    %c0_i32_0 = arith.constant 0 : i32
    return %c0_i32, %arg0 : i32, i32
  }
  func.func @transform_3(%arg0: i32) -> (i32, i32) {
    %c0_i32 = arith.constant 0 : i32
    %c0_i32_0 = arith.constant 0 : i32
    return %c0_i32, %arg0 : i32, i32
  }
}

</mosaic_0001>

<bundles_post_ra>
// kernel: tpu_custom_call.1
= control target key start
LH: loop header
LB: loop body
LE: loop exit
PB: predicated region body
PF: predicated region fallthrough
CT: control target
= control target key end

     0   :  { %8 = vsyncpa [#allocation3], 0  ;;  %s249_s0 = inlined_call_operand.vmem [shape: f32[8,1], index: 0, kind: input, shape index: {}]   ;;  %s250_s1 = inlined_call_operand.hbm [shape: f32[16,256], index: 1, kind: input, shape index: {}]   ;;  %s251_s2 = inlined_call_operand.hbm [shape: f32[8,256], index: 2, kind: input, shape index: {}]   ;;  %s252_s3 = inlined_call_operand.hbm [shape: f32[8,256], index: 3, kind: output, shape index: {}]  }
   0x1   :  { %9 = vsyncpa [#allocation6], 0 }
   0x2   :  { %10 = vsyncpa [#allocation4], 0  ;;  %s17_s14 = sshll.u32 %s250_s1, 4  ;;  %s210_s15 = smov [#allocation2]   ;;  %s18_s14 = int_to_ptr.hbm [resolvable:$true] %s17_s14 }
   0x3   :  { %s19_s16 = sshll.u32 %s210_s15, 4  ;;  %s31_s19 = sshll.u32 %s251_s2, 4  ;;  %s20_s16 = int_to_ptr.vmem [resolvable:$true] %s19_s16  ;;  %s32_s19 = int_to_ptr.hbm [resolvable:$true] %s31_s19 }
   0x4   :  { %s211_s20 = smov 256   ;;  %s212_s21 = smov 16  }
   0x5   :  { %25 = dma.hbm_to_vmem [thread:$0]  %s18_s14, 512, %s20_s16, [#allocation3], %s211_s20, %s211_s20, %s212_s21  }
   0x6   :  { %s213_s22 = smov [#allocation5]  }
   0x7   :  { %s33_s23 = sshll.u32 %s213_s22, 4  ;;  %s34_s23 = int_to_ptr.vmem [resolvable:$true] %s33_s23 }
   0x8   :  { %36 = dma.hbm_to_vmem [thread:$0]  %s32_s19, 256, %s34_s23, [#allocation6]  }
   0x9   :  { %204 = dma.done.wait [#allocation3], 512  }
   0xa   :  { %205 = vsyncadd [#allocation3], 4294966784 }
   0xb   :  { %206 = dma.done.wait [#allocation6], 256  }
   0xc   :  { %207 = vsyncadd [#allocation6], 4294967040  ;;  %v214_v0 = vmov 0   ;;  %v90_v1 = vld [vmem:[%s249_s0] sm:$0xff]  ;;  %v46_v3 = vld [vmem:[#allocation2 + $0x8] sm:$0xff]  ;;  %v215_v6 = vmov 16.0  }
   0xd   :  { %129 = vset.pattern.permute.xlu0 %v214_v0  ;;  %v45_v2 = vld [vmem:[#allocation2] sm:$0xff]  ;;  %v47_v4 = vld [vmem:[#allocation2 + $0x10] sm:$0xff]  ;;  %v48_v5 = vld [vmem:[#allocation2 + $0x18] sm:$0xff]  ;;  %130 = vrcp.f32 %v215_v6  ;;  %s216_s0 = smov [#allocation7]   ;;  %s111_s27 = sshll.u32 %s252_s3, 4  ;;  %s112_s27 = int_to_ptr.hbm [resolvable:$true] %s111_s27 }
   0xe   :  { %95 = vperm.xlu0 %129, %v90_v1   ;;  %v49_v7 = vadd.f32 %v47_v4, %v45_v2  ;;  %v56_v8 = vadd.f32 %v48_v5, %v46_v3  ;;  %v72_v11 = vmax.f32 %v45_v2, %v47_v4  ;;  %v79_v12 = vmax.f32 %v46_v3, %v48_v5  ;;  %v91_v45 = vld [vmem:[#allocation5] sm:$0xff]  ;;  %v92_v46 = vld [vmem:[#allocation5 + $0x8] sm:$0xff]  ;;  %s109_s2 = sshll.u32 %s216_s0, 4  ;;  %s110_s2 = int_to_ptr.vmem [resolvable:$true] %s109_s2 }
  0x10   :  { %v50_v9 = vrot.slane %v49_v7, 4  ;;  %v57_v10 = vrot.slane %v56_v8, 4  ;;  %v73_v16 = vrot.slane %v72_v11, 4  ;;  %v80_v17 = vrot.slane %v79_v12, 4 }
  0x12   :  { %v51_v14 = vadd.f32 %v50_v9, %v49_v7  ;;  %v58_v15 = vadd.f32 %v57_v10, %v56_v8  ;;  %v74_v21 = vmax.f32 %v72_v11, %v73_v16  ;;  %v81_v22 = vmax.f32 %v79_v12, %v80_v17 }
  0x13   :  { %v131_v13 = vpop.eup %130 }
  0x14   :  { %v64_v18 = vmul.f32 16.0, %v131_v13  ;;  %v52_v19 = vrot.slane %v51_v14, 2  ;;  %v59_v20 = vrot.slane %v58_v15, 2  ;;  %v75_v26 = vrot.slane %v74_v21, 2 }
  0x15   :  { %v82_v27 = vrot.slane %v81_v22, 2  ;;  %vm68_vm0 = vweird.f32 %v131_v13 }
  0x16   :  { %v65_v23 = vsub.f32 1.0, %v64_v18  ;;  %v53_v24 = vadd.f32 %v52_v19, %v51_v14  ;;  %v60_v25 = vadd.f32 %v59_v20, %v58_v15  ;;  %v76_v31 = vmax.f32 %v74_v21, %v75_v26 }
  0x17   :  { %v83_v32 = vmax.f32 %v81_v22, %v82_v27 }
  0x18   :  { %v66_v28 = vmul.f32 %v131_v13, %v65_v23  ;;  %v54_v29 = vrot.slane %v53_v24, 1  ;;  %v61_v30 = vrot.slane %v60_v25, 1  ;;  %v77_v36 = vrot.slane %v76_v31, 1 }
  0x19   :  { %v84_v37 = vrot.slane %v83_v32, 1 }
  0x1a   :  { %v67_v33 = vadd.f32 %v131_v13, %v66_v28  ;;  %v55_v34 = vadd.f32 %v54_v29, %v53_v24  ;;  %v62_v35 = vadd.f32 %v61_v30, %v60_v25  ;;  %v78_v41 = vmax.f32 %v76_v31, %v77_v36 }
  0x1b   :  { %v85_v42 = vmax.f32 %v83_v32, %v84_v37 }
  0x1c   :  { %v69_v38 = vsel %vm68_vm0, %v131_v13, %v67_v33 }
  0x1d   :  { %v70_v39 = vmul.f32 %v69_v38, %v55_v34  ;;  %v71_v40 = vmul.f32 %v69_v38, %v62_v35 }
  0x1f   :  { %v86_v43 = vadd.f32 %v78_v41, %v70_v39  ;;  %v87_v44 = vadd.f32 %v85_v42, %v71_v40 }
  0x21   :  { %v88_v47 = vmul.f32 0.5, %v86_v43  ;;  %v89_v48 = vmul.f32 0.5, %v87_v44 }
  0x80   :  { %v96_v49 = vpop.permute.xlu0 %95 }
  0x81   :  { %v98_v50 = vmul.f32 %v96_v49, %v91_v45  ;;  %v99_v51 = vmul.f32 %v96_v49, %v92_v46 }
  0x83   :  { %v100_v52 = vadd.f32 %v98_v50, %v88_v47  ;;  %v101_v53 = vadd.f32 %v99_v51, %v89_v48 }
  0x85   :  { %102 = vst [vmem:[#allocation7] sm:$0xff] %v100_v52 }
  0x86   :  { %103 = vst [vmem:[#allocation7 + $0x8] sm:$0xff] %v101_v53 }
  0x87   :  { %114 = dma.vmem_to_hbm [thread:$0]  %s110_s2, 256, %s112_s27, [#allocation4]  }
  0x88   :  { %208 = dma.done.wait [#allocation4], 256  }
  0x89   :  { %209 = vsyncadd [#allocation4], 4294967040 }
  0x8a   :  { %119 = vsyncpa [#allocation3], 1 }
  0x8b   :  { %120 = vsyncpa [#allocation6], 1 }
  0x8c   :  { %121 = vsyncpa [#allocation4], 1 }

</bundles_post_ra>
